<compile_context>
chip_gen: v7x
topology: tpu7x:2x2x1
jax: 0.10.0
libtpu: 0.0.40
codegen_flags: <defaults>
</compile_context>

<pallas_src>
import jax
import jax.numpy as jnp
from jax.experimental import pallas as pl
from jax.experimental.pallas import tpu as pltpu


def _dma_copy_kernel(x_hbm_ref, o_hbm_ref, sem):
    # Whole-array HBM -> HBM copy on the DMA engine; no VMEM staging, no
    # vector-unit work.
    cp = pltpu.make_async_copy(x_hbm_ref, o_hbm_ref, sem)
    cp.start()
    cp.wait()


def _dma_copy(x):
    """Materialize a copy of `x` via a single direct HBM->HBM DMA."""
    nbytes = x.size * jnp.dtype(x.dtype).itemsize
    return pl.pallas_call(
        _dma_copy_kernel,
        out_shape=jax.ShapeDtypeStruct(x.shape, x.dtype),
        in_specs=[pl.BlockSpec(memory_space=pl.ANY)],
        out_specs=pl.BlockSpec(memory_space=pl.ANY),
        scratch_shapes=[pltpu.SemaphoreType.DMA],
        cost_estimate=pl.CostEstimate(
            flops=0, transcendentals=0, bytes_accessed=2 * nbytes),
    )(x)


def base_connector_forward(x, memo, *, in_channels, out_channels,
                           materialize=False, xla_copy_below_bytes=0):
    """Pallas implementation of BaseConnector.forward.

    x: (N, C, H, W) activation (NCHW, matching the PyTorch convention).
    memo: arbitrary Python object, passed through untouched.
    materialize: if False (default, matching the module's semantics) the input
      is returned directly — an identity costs nothing and launches no kernel.
      If True, a fresh copy is produced by a single HBM->HBM DMA kernel.
    xla_copy_below_bytes: optional size threshold; tensors smaller than this
      are copied with plain XLA instead of launching a Pallas kernel (launch
      overhead dominates for tiny tensors). Default 0 = always use the kernel.
    """
    # Trace-time check, same semantics as the PyTorch assert (static shapes).
    assert x.shape[1] == in_channels == out_channels
    if not materialize:
        return x, memo
    nbytes = x.size * jnp.dtype(x.dtype).itemsize
    if nbytes < xla_copy_below_bytes:
        return jnp.asarray(x).copy(), memo
    return _dma_copy(x), memo


if __name__ == "__main__":
    key = jax.random.PRNGKey(0)
    N, C, H, W = 2, 4, 16, 16  # x: NCHW
    x = jax.random.normal(key, (N, C, H, W), dtype=jnp.float32)
    memo = {}

    # Fast path (what production should use): zero-cost identity, no kernel.
    y_fast, memo_fast = base_connector_forward(x, memo, in_channels=C, out_channels=C)
    assert y_fast is x
    assert memo_fast is memo

    # Kernel path: direct HBM->HBM DMA copy when a materialized output is needed.
    y, memo_out = base_connector_forward(
        x, memo, in_channels=C, out_channels=C, materialize=True)
    y = jax.block_until_ready(y)
    assert y.shape == x.shape
    assert y.dtype == x.dtype
    assert jnp.array_equal(y, x)
    assert memo_out is memo

    # Second shape: spatial dims not 128-aligned (56*56) and odd channel count —
    # the DMA path needs no padding/reshape, traffic stays at 2N.
    x2 = jax.random.normal(jax.random.PRNGKey(1), (2, 3, 56, 56), dtype=jnp.float32)
    y2, _ = base_connector_forward(x2, memo, in_channels=3, out_channels=3,
                                   materialize=True)
    y2 = jax.block_until_ready(y2)
    assert jnp.array_equal(y2, x2)

    # Sub-32-bit dtype: no sublane-packing concerns on the pure-DMA path.
    x3 = jax.random.normal(jax.random.PRNGKey(2), (2, 4, 16, 16)).astype(jnp.bfloat16)
    y3, _ = base_connector_forward(x3, memo, in_channels=4, out_channels=4,
                                   materialize=True)
    y3 = jax.block_until_ready(y3)
    assert y3.dtype == jnp.bfloat16
    assert jnp.array_equal(y3, x3)

    print("KERNEL_OK")
</pallas_src>

<mosaic_0001>
module attributes {stable_mosaic.version = 11 : i64} {
  func.func @_dma_copy_kernel(%arg0: memref<2x4x16x16xf32, #tpu.memory_space<any>>, %arg1: memref<2x4x16x16xf32, #tpu.memory_space<any>>, %arg2: memref<!tpu.dma_semaphore, #tpu.memory_space<semaphore_mem>>) attributes {dimension_semantics = [], scalar_prefetch = 0 : i64, scratch_operands = 1 : i64, tpu.core_type = #tpu.core_type<tc>} {
    tpu.enqueue_dma source(%arg0 : memref<2x4x16x16xf32, #tpu.memory_space<any>>) target(%arg1 : memref<2x4x16x16xf32, #tpu.memory_space<any>>) target_semaphore(%arg2 : memref<!tpu.dma_semaphore, #tpu.memory_space<semaphore_mem>>)
    tpu.wait_dma2 semaphore(%arg2 : memref<!tpu.dma_semaphore, #tpu.memory_space<semaphore_mem>>) src(%arg0 : memref<2x4x16x16xf32, #tpu.memory_space<any>>) dst(%arg1 : memref<2x4x16x16xf32, #tpu.memory_space<any>>)
    return
  }
}

</mosaic_0001>

<bundles_post_ra>
// kernel: tpu_custom_call.1
= control target key start
LH: loop header
LB: loop body
LE: loop exit
PB: predicated region body
PF: predicated region fallthrough
CT: control target
= control target key end

     0   :  { %s36_s6 = smov [#allocation2]   ;;  %s37_s7 = smov [#allocation3]   ;;  %s55_s0 = inlined_call_operand.hbm [shape: f32[2,4,16,16], index: 0, kind: input, shape index: {}]   ;;  %s56_s1 = inlined_call_operand.hbm [shape: f32[2,4,16,16], index: 1, kind: output, shape index: {}]  }
   0x1   :  { %s38_s8 = smov 0  }
   0x2   :  { %18 = dma.general %s55_s0, 2048, %s56_s1, %s36_s6, %s37_s7, [#allocation4], %s38_s8, 0  }
   0x3   :  { %34 = dma.done.wait [#allocation2], 2048 }
   0x4   :  { %35 = vsyncadd [#allocation2], 4294965248 }
   0x5   :  { %24 = vsyncmov [#allocation2] }
   0x8   :  { %s25_s13 = vpop.sfrf %24 }
   0x9   :  { %p30_p0 = scmp.ne.s32.totalorder %s25_s13, 0 }
   0xb   :  { %29 = shalt.err (%p30_p0)  }

</bundles_post_ra>
